<compile_context>
chip_gen: v7x
topology: tpu7x:2x2x1
jax: 0.10.0
libtpu: 0.0.40
codegen_flags: <defaults>
</compile_context>

<pallas_src>
import functools

import numpy as np

import jax
import jax.numpy as jnp
from jax.experimental import pallas as pl
from jax.experimental.pallas import tpu as pltpu


def _graph_conv_kernel(x_ref, l_ref, w_ref, b_ref, o_ref, a_ref, *, K, BT, C, N,
                       compute_dtype):
    # x_ref: (1, N, BT*C) compute_dtype -- lane index = b*C + c
    # l_ref: (N, N)       compute_dtype -- whole-array VMEM resident
    # w_ref: (K*C, O_pad) compute_dtype -- row index = k*C + c
    # b_ref: (1, O_pad)   f32           -- whole-array VMEM resident
    # o_ref: (1, BT*N, O_pad)           -- row index = b*N + n
    # a_ref: (BT*N, K*C)  compute_dtype VMEM scratch (the fused "A" operand)

    def stream_term(term_c, k):
        # Scatter T_k (N, BT*C) into A rows (b*N + n), cols (k*C + c).
        # Only the current term is live while storing -> bounded vreg pressure.
        for b in range(BT):
            a_ref[b * N:(b + 1) * N, k * C:(k + 1) * C] = (
                term_c[:, b * C:(b + 1) * C])

    Lm = l_ref[...]                              # (N, N) compute_dtype
    t0 = x_ref[0]                                # (N, BT*C) compute_dtype
    stream_term(t0, 0)

    if K >= 2:
        # Chebyshev recurrence: bf16 MXU operands, f32 accumulation; only the
        # last two terms are kept live in f32.
        t_prev = jnp.dot(Lm, t0, preferred_element_type=jnp.float32)
        stream_term(t_prev.astype(compute_dtype), 1)
        t_prev2 = t0.astype(jnp.float32)
        for k in range(2, K):
            t_new = 2.0 * jnp.dot(Lm, t_prev.astype(compute_dtype),
                                  preferred_element_type=jnp.float32) - t_prev2
            stream_term(t_new.astype(compute_dtype), k)
            t_prev2, t_prev = t_prev, t_new

    # Single fused output projection for all K orders (+ f32 bias add).
    out = jnp.dot(a_ref[...], w_ref[...], preferred_element_type=jnp.float32)
    out = out + b_ref[...]
    o_ref[0] = out.astype(o_ref.dtype)


def graph_conv_forward(x, L, weight_kco, bias, K, *, batch_tile=None,
                       compute_dtype=jnp.bfloat16, lane_target=512,
                       vmem_budget_bytes=40 * 1024 * 1024):
    """x: (B, N, C), L: (N, N), weight_kco: (K, C, O), bias: (1, O)."""
    B, N, C = x.shape
    O = weight_kco.shape[-1]
    out_dtype = x.dtype
    csize = np.dtype(compute_dtype).itemsize

    # Lane-dense output staging: pad O up to a multiple of 128.
    O_pad = ((O + 127) // 128) * 128

    def vmem_estimate(bt):
        resident = N * N * csize + K * C * O_pad * csize + O_pad * 4
        x_blk = N * bt * C * csize                   # pipelined (x2 buffers)
        out_blk = bt * N * O_pad * 4                 # pipelined (x2 buffers)
        a_scr = bt * N * K * C * csize               # A scratch
        live = 3 * N * bt * C * 4 + bt * N * O_pad * 4   # f32 terms + out value
        return resident + 2 * x_blk + 2 * out_blk + a_scr + live

    if batch_tile is None:
        # Target >= ~512 lanes in the recurrence matmuls (full v6e/v7x MXU
        # width), shrink to fit the VMEM budget.
        BT = max(1, min(B, max(1, lane_target // max(C, 1))))
        while BT > 1 and vmem_estimate(BT) > vmem_budget_bytes:
            BT = max(1, BT // 2)
        # Keep >= 2 grid chunks (both v7x TCs) when each half still has >= 128
        # lanes; otherwise keep the single big chunk (best for v5e/v6e).
        if pl.cdiv(B, BT) == 1 and B > 1 and ((B + 1) // 2) * C >= 128:
            BT = (B + 1) // 2
    else:
        BT = max(1, min(batch_tile, B))

    num_chunks = pl.cdiv(B, BT)
    B_pad = num_chunks * BT
    if B_pad != B:
        # Padded rows are computed (bias-only garbage) and sliced off below.
        x = jnp.pad(x, ((0, B_pad - B), (0, 0), (0, 0)))

    # Fold batch into lanes for the recurrence: (chunks, N, BT*C), lane = b*C+c.
    # Cast to bf16 at the boundary: all MXU consumers of x are bf16.
    x_f = (x.reshape(num_chunks, BT, N, C)
             .transpose(0, 2, 1, 3)
             .reshape(num_chunks, N, BT * C)
             .astype(compute_dtype))

    w_mat = weight_kco.reshape(K * C, O)
    w_mat = jnp.pad(w_mat, ((0, 0), (0, O_pad - O))).astype(compute_dtype)
    b_pad = jnp.pad(bias.astype(jnp.float32).reshape(1, O),
                    ((0, 0), (0, O_pad - O)))
    L_c = L.astype(compute_dtype)

    # If O-padding inflates writeback >= 4x, stage the output in bf16 to halve
    # HBM write bytes (matters most on v5e); wrapper casts back.
    store_dtype = (jnp.bfloat16
                   if (O_pad >= 4 * O and np.dtype(out_dtype).itemsize > 2)
                   else out_dtype)

    est = vmem_estimate(BT)
    vmem_limit = int(min(64 * 1024 * 1024,
                         max(32 * 1024 * 1024, int(1.5 * est))))

    kernel = functools.partial(_graph_conv_kernel, K=K, BT=BT, C=C, N=N,
                               compute_dtype=compute_dtype)
    out = pl.pallas_call(
        kernel,
        out_shape=jax.ShapeDtypeStruct((num_chunks, BT * N, O_pad), store_dtype),
        grid=(num_chunks,),
        in_specs=[
            # x chunk: pipelined over the batch-chunk grid axis.
            pl.BlockSpec((1, N, BT * C), lambda i: (i, 0, 0)),
            # Grid-invariant operands: whole-array, single-buffered VMEM residents.
            pl.BlockSpec(memory_space=pltpu.MemorySpace.VMEM),   # L
            pl.BlockSpec(memory_space=pltpu.MemorySpace.VMEM),   # weights
            pl.BlockSpec(memory_space=pltpu.MemorySpace.VMEM),   # bias
        ],
        out_specs=pl.BlockSpec((1, BT * N, O_pad), lambda i: (i, 0, 0)),
        scratch_shapes=[pltpu.VMEM((BT * N, K * C), compute_dtype)],
        compiler_params=pltpu.CompilerParams(
            dimension_semantics=("parallel",),
            vmem_limit_bytes=vmem_limit),
    )(x_f, L_c, w_mat, b_pad)

    # (chunks, BT*N, O_pad) -> (B, N, O), caller dtype.
    out = out.reshape(num_chunks * BT, N, O_pad)[:B, :, :O]
    return out.astype(out_dtype)


def graph_conv_reference(x, L, weight_kco, bias, K):
    """Pure-JAX f32 reference mirroring the PyTorch module."""
    cheb = [x]
    if K >= 2:
        cheb.append(jnp.einsum("nm,bmc->bnc", L, x))
    for _ in range(2, K):
        cheb.append(2.0 * jnp.einsum("nm,bmc->bnc", L, cheb[-1]) - cheb[-2])
    cheb = jnp.stack(cheb, axis=-1)                       # (B, N, C, K)
    out = jnp.einsum("bnck,kco->bno", cheb, weight_kco)
    return out + bias[0]


if __name__ == "__main__":
    B, N, C, K, O = 2, 16, 4, 3, 8  # batch, stations, in_channel, Cheb order, out_channel

    key = jax.random.PRNGKey(0)
    kx, kL, kw, kb = jax.random.split(key, 4)

    x = jax.random.normal(kx, (B, N, C), dtype=jnp.float32)

    # Symmetric, normalized-Laplacian-like matrix (deterministic).
    A = jax.random.normal(kL, (N, N), dtype=jnp.float32)
    Lmat = 0.1 * (A + A.T) / 2.0

    # PyTorch: nn.ModuleList of C Linear(K, O, bias=False) -> per-channel W_c (O, K).
    w_cok = jax.random.normal(kw, (C, O, K), dtype=jnp.float32) * 0.1
    weight_kco = jnp.transpose(w_cok, (2, 0, 1))          # (K, C, O)
    bias = jax.random.normal(kb, (1, O), dtype=jnp.float32)

    out = graph_conv_forward(x, Lmat, weight_kco, bias, K)
    out = jax.block_until_ready(out)

    ref = graph_conv_reference(x, Lmat, weight_kco, bias, K)
    assert out.shape == (B, N, O)
    # bf16 MXU operands / bf16 staging with f32 accumulation -> loose tolerance.
    # For K >= 4 or large spectral radius of L, pass compute_dtype=jnp.float32.
    assert jnp.allclose(out, ref, atol=5e-2, rtol=5e-2), "mismatch vs reference"

    print("KERNEL_OK")
</pallas_src>

<mosaic_0001>
module attributes {stable_mosaic.version = 11 : i64} {
  func.func @_graph_conv_kernel(%arg0: i32, %arg1: memref<1x16x8xbf16, #tpu.memory_space<vmem>>, %arg2: memref<16x16xbf16, #tpu.memory_space<vmem>>, %arg3: memref<12x128xbf16, #tpu.memory_space<vmem>>, %arg4: memref<1x128xf32, #tpu.memory_space<vmem>>, %arg5: memref<1x32x128xbf16, #tpu.memory_space<vmem>>, %arg6: memref<32x12xbf16, #tpu.memory_space<vmem>>) attributes {dimension_semantics = [#tpu.dimension_semantics<parallel>], iteration_bounds = array<i64: 1>, scalar_prefetch = 0 : i64, scratch_operands = 1 : i64, tpu.core_type = #tpu.core_type<tc>, window_params = [{transform_indices = @transform_0, window_bounds = array<i64: 1, 16, 8>}, {pipeline_mode = #tpu.pipeline_mode<synchronous>, transform_indices = @transform_1, window_bounds = array<i64: 16, 16>}, {pipeline_mode = #tpu.pipeline_mode<synchronous>, transform_indices = @transform_2, window_bounds = array<i64: 12, 128>}, {pipeline_mode = #tpu.pipeline_mode<synchronous>, transform_indices = @transform_3, window_bounds = array<i64: 1, 128>}, {transform_indices = @transform_4, window_bounds = array<i64: 1, 32, 128>}]} {
    %c0 = arith.constant 0 : index
    %c0_0 = arith.constant 0 : index
    %0 = vector.load %arg2[%c0, %c0_0] : memref<16x16xbf16, #tpu.memory_space<vmem>>, vector<16x16xbf16>
    %c0_1 = arith.constant 0 : index
    %c0_2 = arith.constant 0 : index
    %c0_3 = arith.constant 0 : index
    %1 = vector.load %arg1[%c0_1, %c0_2, %c0_3] : memref<1x16x8xbf16, #tpu.memory_space<vmem>>, vector<1x16x8xbf16>
    %2 = vector.shape_cast %1 : vector<1x16x8xbf16> to vector<16x8xbf16>
    %3 = vector.extract_strided_slice %2 {offsets = [0, 0], sizes = [16, 4], strides = [1, 1]} : vector<16x8xbf16> to vector<16x4xbf16>
    %c0_4 = arith.constant 0 : index
    %c0_5 = arith.constant 0 : index
    %4 = vector.load %arg6[%c0_4, %c0_5] : memref<32x12xbf16, #tpu.memory_space<vmem>>, vector<16x4xbf16>
    tpu.vector_store %arg6[%c0_4, %c0_5], %3 {strides = array<i32>} : memref<32x12xbf16, #tpu.memory_space<vmem>>, vector<16x4xbf16>,
    %5 = vector.extract_strided_slice %2 {offsets = [0, 4], sizes = [16, 4], strides = [1, 1]} : vector<16x8xbf16> to vector<16x4xbf16>
    %c16 = arith.constant 16 : index
    %c0_6 = arith.constant 0 : index
    %6 = vector.load %arg6[%c16, %c0_6] : memref<32x12xbf16, #tpu.memory_space<vmem>>, vector<16x4xbf16>
    tpu.vector_store %arg6[%c16, %c0_6], %5 {strides = array<i32>} : memref<32x12xbf16, #tpu.memory_space<vmem>>, vector<16x4xbf16>,
    %cst = arith.constant dense<0.000000e+00> : vector<16x8xf32>
    %7 = tpu.matmul %0, %2, %cst {dimension_numbers = #tpu.dot_dimension_numbers<[1], [0], [0], [1], [0, 0, 1, 1], [], []>} : vector<16x16xbf16>, vector<16x8xbf16>, vector<16x8xf32> -> vector<16x8xf32>
    %8 = arith.truncf %7 : vector<16x8xf32> to vector<16x8xbf16>
    %9 = vector.extract_strided_slice %8 {offsets = [0, 0], sizes = [16, 4], strides = [1, 1]} : vector<16x8xbf16> to vector<16x4xbf16>
    %c0_7 = arith.constant 0 : index
    %c4 = arith.constant 4 : index
    %10 = vector.load %arg6[%c0_7, %c4] : memref<32x12xbf16, #tpu.memory_space<vmem>>, vector<16x4xbf16>
    tpu.vector_store %arg6[%c0_7, %c4], %9 {strides = array<i32>} : memref<32x12xbf16, #tpu.memory_space<vmem>>, vector<16x4xbf16>,
    %11 = vector.extract_strided_slice %8 {offsets = [0, 4], sizes = [16, 4], strides = [1, 1]} : vector<16x8xbf16> to vector<16x4xbf16>
    %c16_8 = arith.constant 16 : index
    %c4_9 = arith.constant 4 : index
    %12 = vector.load %arg6[%c16_8, %c4_9] : memref<32x12xbf16, #tpu.memory_space<vmem>>, vector<16x4xbf16>
    tpu.vector_store %arg6[%c16_8, %c4_9], %11 {strides = array<i32>} : memref<32x12xbf16, #tpu.memory_space<vmem>>, vector<16x4xbf16>,
    %13 = arith.extf %2 : vector<16x8xbf16> to vector<16x8xf32>
    %14 = arith.truncf %7 : vector<16x8xf32> to vector<16x8xbf16>
    %cst_10 = arith.constant dense<0.000000e+00> : vector<16x8xf32>
    %15 = tpu.matmul %0, %14, %cst_10 {dimension_numbers = #tpu.dot_dimension_numbers<[1], [0], [0], [1], [0, 0, 1, 1], [], []>} : vector<16x16xbf16>, vector<16x8xbf16>, vector<16x8xf32> -> vector<16x8xf32>
    %cst_11 = arith.constant 2.000000e+00 : f32
    %16 = vector.broadcast %cst_11 : f32 to vector<16x8xf32>
    %17 = arith.mulf %16, %15 : vector<16x8xf32>
    %18 = arith.subf %17, %13 : vector<16x8xf32>
    %19 = arith.truncf %18 : vector<16x8xf32> to vector<16x8xbf16>
    %20 = vector.extract_strided_slice %19 {offsets = [0, 0], sizes = [16, 4], strides = [1, 1]} : vector<16x8xbf16> to vector<16x4xbf16>
    %c0_12 = arith.constant 0 : index
    %c8 = arith.constant 8 : index
    %21 = vector.load %arg6[%c0_12, %c8] : memref<32x12xbf16, #tpu.memory_space<vmem>>, vector<16x4xbf16>
    tpu.vector_store %arg6[%c0_12, %c8], %20 {strides = array<i32>} : memref<32x12xbf16, #tpu.memory_space<vmem>>, vector<16x4xbf16>,
    %22 = vector.extract_strided_slice %19 {offsets = [0, 4], sizes = [16, 4], strides = [1, 1]} : vector<16x8xbf16> to vector<16x4xbf16>
    %c16_13 = arith.constant 16 : index
    %c8_14 = arith.constant 8 : index
    %23 = vector.load %arg6[%c16_13, %c8_14] : memref<32x12xbf16, #tpu.memory_space<vmem>>, vector<16x4xbf16>
    tpu.vector_store %arg6[%c16_13, %c8_14], %22 {strides = array<i32>} : memref<32x12xbf16, #tpu.memory_space<vmem>>, vector<16x4xbf16>,
    %c0_15 = arith.constant 0 : index
    %c0_16 = arith.constant 0 : index
    %24 = vector.load %arg6[%c0_15, %c0_16] : memref<32x12xbf16, #tpu.memory_space<vmem>>, vector<32x12xbf16>
    %c0_17 = arith.constant 0 : index
    %c0_18 = arith.constant 0 : index
    %25 = vector.load %arg3[%c0_17, %c0_18] : memref<12x128xbf16, #tpu.memory_space<vmem>>, vector<12x128xbf16>
    %cst_19 = arith.constant dense<0.000000e+00> : vector<32x128xf32>
    %26 = tpu.matmul %24, %25, %cst_19 {dimension_numbers = #tpu.dot_dimension_numbers<[1], [0], [0], [1], [0, 0, 1, 1], [], []>} : vector<32x12xbf16>, vector<12x128xbf16>, vector<32x128xf32> -> vector<32x128xf32>
    %c0_20 = arith.constant 0 : index
    %c0_21 = arith.constant 0 : index
    %27 = vector.load %arg4[%c0_20, %c0_21] : memref<1x128xf32, #tpu.memory_space<vmem>>, vector<1x128xf32>
    %28 = vector.broadcast %27 : vector<1x128xf32> to vector<32x128xf32>
    %29 = arith.addf %26, %28 : vector<32x128xf32>
    %30 = arith.truncf %29 : vector<32x128xf32> to vector<32x128xbf16>
    %c0_22 = arith.constant 0 : index
    %c0_23 = arith.constant 0 : index
    %c0_24 = arith.constant 0 : index
    %31 = vector.load %arg5[%c0_22, %c0_23, %c0_24] : memref<1x32x128xbf16, #tpu.memory_space<vmem>>, vector<1x32x128xbf16>
    %32 = vector.shape_cast %31 : vector<1x32x128xbf16> to vector<32x128xbf16>
    %33 = vector.shape_cast %30 : vector<32x128xbf16> to vector<1x32x128xbf16>
    tpu.vector_store %arg5[%c0_22, %c0_23, %c0_24], %33 {strides = array<i32>} : memref<1x32x128xbf16, #tpu.memory_space<vmem>>, vector<1x32x128xbf16>,
    return
  }
  func.func @transform_0(%arg0: i32) -> (i32, i32, i32) {
    %c0_i32 = arith.constant 0 : i32
    %c0_i32_0 = arith.constant 0 : i32
    %c0_i32_1 = arith.constant 0 : i32
    return %arg0, %c0_i32, %c0_i32_0 : i32, i32, i32
  }
  func.func @transform_1(%arg0: i32) -> (i32, i32) {
    %c0_i32 = arith.constant 0 : i32
    %c0_i32_0 = arith.constant 0 : i32
    %c0_i32_1 = arith.constant 0 : i32
    return %c0_i32, %c0_i32_0 : i32, i32
  }
  func.func @transform_2(%arg0: i32) -> (i32, i32) {
    %c0_i32 = arith.constant 0 : i32
    %c0_i32_0 = arith.constant 0 : i32
    %c0_i32_1 = arith.constant 0 : i32
    return %c0_i32, %c0_i32_0 : i32, i32
  }
  func.func @transform_3(%arg0: i32) -> (i32, i32) {
    %c0_i32 = arith.constant 0 : i32
    %c0_i32_0 = arith.constant 0 : i32
    %c0_i32_1 = arith.constant 0 : i32
    return %c0_i32, %c0_i32_0 : i32, i32
  }
  func.func @transform_4(%arg0: i32) -> (i32, i32, i32) {
    %c0_i32 = arith.constant 0 : i32
    %c0_i32_0 = arith.constant 0 : i32
    %c0_i32_1 = arith.constant 0 : i32
    return %arg0, %c0_i32, %c0_i32_0 : i32, i32, i32
  }
}

</mosaic_0001>

<bundles_post_ra>
// kernel: tpu_custom_call.1
= control target key start
LH: loop header
LB: loop body
LE: loop exit
PB: predicated region body
PF: predicated region fallthrough
CT: control target
= control target key end

     0   :  { %v351_v1 = vmov 0.0   ;;  %vm352_vm0 = vmmov 0   ;;  %s412_s0 = inlined_call_operand.vmem [shape: bf16[1,16,8], index: 0, kind: input, shape index: {}]   ;;  %s413_s1 = inlined_call_operand.vmem [shape: bf16[16,16], index: 1, kind: input, shape index: {}]   ;;  %s414_s2 = inlined_call_operand.vmem [shape: bf16[12,128], index: 2, kind: input, shape index: {}]   ;;  %s415_s3 = inlined_call_operand.vmem [shape: f32[1,128], index: 3, kind: input, shape index: {}]   ;;  %s416_s4 = inlined_call_operand.hbm [shape: bf16[1,32,128], index: 4, kind: output, shape index: {}]  }
   0x1   :  { %v21_v0 = vld [vmem:[%s412_s0] sm:$0xff]   ;;  %297 = vmatprep.subr.bf16.mxu0 %v351_v1  ;;  %299 = vmatprep.mubr.msk.bf16.mxu0 %vm352_vm0, %v351_v1 }
   0x2   :  { %v324_v2 = vld [vmem:[%s413_s1] sm:$0xff]   ;;  %303 = vmatprep.subr.bf16.mxu1 %v351_v1  ;;  %305 = vmatprep.mubr.msk.bf16.mxu1 %vm352_vm0, %v351_v1 }
   0x3   :  { %9 = vsyncpa [#allocation4], 0  ;;  %298 = vmatpush3.bf16.msra.mxu0 %v21_v0  ;;  %vm40_vm1 = vcmask 130048   ;;  %s353_s19 = smov 124   ;;  %vm29_vm2 = vcmask 31744   ;;  %vm90_vm3 = vcmask 64544   ;;  %v93_v13 = vunpack.c.l.bf16 %v21_v0 }
   0x4   :  { %31 = vrot.lane.b32.xlu0 %v21_v0, %s353_s19  ;;  %30 = vst.msk [vmem:[#allocation2] sm:$0xff] %vm29_vm2, %v21_v0  ;;  %s354_s0 = smov 4   ;;  %v325_v10 = vld [vmem:[%s414_s2] sm:$0x3f]   ;;  %vm174_vm4 = vcmask 1045504   ;;  %v94_v16 = vunpack.c.h.bf16 %v21_v0  ;;  %s355_s21 = smov 8  }
   0x5   :  { %315 = vmatprep.subr.msk.bf16.mxu0 %vm174_vm4, %v325_v10  ;;  %v176_v12 = vsel %vm174_vm4, %v325_v10, 0  ;;  %vm145_vm5 = vcmask 97344   ;;  %vm167_vm6 = vcmask 97280   ;;  %v267_v28 = vld [vmem:[%s415_s3] ss:$0 sm:$0xff]  ;;  %s356_s23 = smov [#allocation3]  }
   0x6   :  { %300 = vmatmul.mubr.msk.bf16.vlgmr.msra.gmra.mrb[0].mxu0 %vm40_vm1, %v324_v2  ;;  %s252_s24 = sshll.u32 %s356_s23, 4  ;;  %s253_s24 = int_to_ptr.vmem [resolvable:$true] %s252_s24 }
   0x7   :  { %310 = vmatpush3.bf16.msra.mxu0 %v176_v12  ;;  %s327_s25 = scalar_lea.vmem %s253_s24, 256  ;;  %p332_p1 = scmp.lt.s32.totalorder %s253_s24, %s253_s24 }
   0x8   :  { %p328_p0 = scmp.ne.s32.totalorder %s253_s24, %s327_s25  ;;  %p333_p2 = scmp.lt.s32.totalorder %s327_s25, %s327_s25 }
   0xa   :  { %p334_p3 = por %p333_p2, %p332_p1 }
   0xc   :  { %p335_p4 = pnand %p334_p3, %p328_p0 }
  0x76   :  { %v32_v3 = vpop.permute.xlu0 %31 }
  0x77   :  { %34 = vst.msk [vmem:[#allocation2 + $0x8] sm:$0xff] %vm29_vm2, %v32_v3 }
  0xd9   :  { %v78_v4 = vpop.f32.mrb[0].mxu0 }
  0xda   :  { %v301_v5 = vpop.f32.mrb[1].mxu0 }
  0xdb   :  { %v81_v6 = vpop.f32.mrb[2].mxu0 }
  0xdc   :  { %v85_v7 = vpack.c.bf16 %v81_v6, %v78_v4  ;;  %v302_v8 = vpop.f32.mrb[3].mxu0 }
  0xde   :  { %92 = vst.msk [vmem:[#allocation2 + $0x8] sm:$0xff] %vm90_vm3, %v85_v7  ;;  %87 = vrot.lane.b32.xlu0 %v85_v7, %s354_s0  ;;  %304 = vmatpush3.bf16.msra.mxu1 %v85_v7 }
  0xe1   :  { %306 = vmatmul.mubr.msk.bf16.vlgmr.msra.gmra.mrb[0].mxu1 %vm40_vm1, %v324_v2 }
 0x150   :  { %v88_v9 = vpop.permute.xlu0 %87 }
 0x151   :  { %91 = vst.msk [vmem:[#allocation2] sm:$0xff] %vm90_vm3, %v88_v9 }
 0x1b4   :  { %v129_v11 = vpop.f32.mrb[0].mxu1 }
 0x1b5   :  { %v136_v14 = vmul.f32 2.0, %v129_v11  ;;  %v307_v15 = vpop.f32.mrb[1].mxu1 }
 0x1b6   :  { %v132_v17 = vpop.f32.mrb[2].mxu1 }
 0x1b7   :  { %v137_v18 = vmul.f32 2.0, %v132_v17  ;;  %v308_v19 = vpop.f32.mrb[3].mxu1  ;;  %v138_v20 = vsub.f32 %v136_v14, %v93_v13 }
 0x1b9   :  { %v139_v21 = vsub.f32 %v137_v18, %v94_v16 }
 0x1bb   :  { %v140_v22 = vpack.c.bf16 %v139_v21, %v138_v20 }
 0x1bd   :  { %142 = vrot.lane.b32.xlu1 %v140_v22, %s355_s21 }
 0x1c1   :  { %147 = vrot.lane.b32.xlu1 %v140_v22, %s354_s0 }
 0x22f   :  { %v143_v23 = vpop.permute.xlu1 %142 }
 0x230   :  { %146 = vst.msk [vmem:[#allocation2] sm:$0xff] %vm145_vm5, %v143_v23 }
 0x233   :  { %v148_v24 = vpop.permute.xlu1 %147 }
 0x234   :  { %150 = vst.msk [vmem:[#allocation2 + $0x8] sm:$0xff] %vm145_vm5, %v148_v24 }
 0x237   :  { %v151_v25 = vld [vmem:[#allocation2] sm:$0xff] }
 0x238   :  { %311 = vmatprep.mubr.msk.bf16.mxu0 %vm167_vm6, %v151_v25 }
 0x23b   :  { %v152_v26 = vld [vmem:[#allocation2 + $0x8] sm:$0xff] }
 0x23c   :  { %312 = vmatmul.mubr.msk.bf16.vlgmr.msra.gmra.mrb[4].mxu0 %vm167_vm6, %v152_v26 }
 0x30f   :  { %v313_v27 = vpop.f32.mrb[4].mxu0 }
 0x310   :  { %v212_v29 = vpop.f32.mrb[5].mxu0  ;;  %v221_v31 = vadd.f32 %v313_v27, %v267_v28 }
 0x311   :  { %v314_v30 = vpop.f32.mrb[6].mxu0  ;;  %v213_v34 = vadd.f32 %v267_v28, %v212_v29 }
 0x312   :  { %v224_v32 = vadd.f32 %v314_v30, %v267_v28  ;;  %v215_v33 = vpop.f32.mrb[7].mxu0 }
 0x313   :  { %v216_v35 = vadd.f32 %v267_v28, %v215_v33 }
 0x314   :  { %v287_v36 = vpack.c.bf16 %v224_v32, %v221_v31 }
 0x315   :  { %v282_v37 = vpack.c.bf16 %v216_v35, %v213_v34 }
 0x316   :  { %289 = vst [vmem:[#allocation3 + $0x8] sm:$0xff] %v287_v36  }
 0x317   :  { %283 = vst [vmem:[#allocation3] sm:$0xff] %v282_v37  }
 0x318   :  { %338 = shalt.err (!%p335_p4)
}
 0x319   :  { %s339_s27 = scalar_lea.hbm %s416_s4, 256 }
 0x31a   :  { %p340_p5 = scmp.ne.s32.totalorder %s416_s4, %s339_s27  ;;  %p343_p6 = scmp.lt.u32.totalorder %s339_s27, %s416_s4 }
 0x31c   :  { %p345_p7 = pnand %p343_p6, %p340_p5 }
 0x31e   :  { %348 = shalt.err (!%p345_p7)
}
 0x31f   :  { %s357_s6 = smov 64  }
 0x320   :  { %258 = dma.vmem_to_hbm [thread:$0]  %s253_s24, 256, %s416_s4, [#allocation4], %s357_s6, %s357_s6, %s354_s0  }
 0x321   :  { %349 = dma.done.wait [#allocation4], 256  }
 0x322   :  { %350 = vsyncadd [#allocation4], 4294967040 }
 0x323   :  { %262 = vsyncpa [#allocation4], 1 }

</bundles_post_ra>
